<compile_context>
chip_gen: v7x
topology: tpu7x:2x2x1
jax: 0.10.0
libtpu: 0.0.40
codegen_flags: <defaults>
</compile_context>

<pallas_src>
import functools

import jax
import jax.numpy as jnp
from jax import lax
from jax.experimental import pallas as pl
from jax.experimental.pallas import tpu as pltpu

_LANES = 128
_SUBLANES = 8
# 4096x128 f32 = 2 MiB per input block; 2 inputs x 2 pipeline buffers = 8 MiB
# plus a 4 KiB accumulator and elementwise temporaries -> comfortably inside
# the explicit 32 MiB scoped-VMEM limit on v5e/v6e (128 MiB physical) and v7x
# (64 MiB physical, 32 MiB default scoped).
_MAX_BLOCK_ROWS = 4096
_VMEM_LIMIT_BYTES = 32 * 1024 * 1024


@functools.lru_cache(maxsize=None)
def _num_tensorcores() -> int:
    """Best-effort TensorCore count per chip (1 on v5e/v6e, 2 on v7x)."""
    try:
        info = pltpu.get_tpu_info()
        for name in ("num_cores", "core_count", "num_tensorcores",
                     "tensorcore_count", "cores_per_chip",
                     "num_cores_per_chip"):
            n = getattr(info, name, None)
            if isinstance(n, int) and n > 0:
                return n
    except Exception:
        pass
    try:
        n = getattr(jax.local_devices()[0], "num_cores", None)
        if isinstance(n, int) and n > 0:
            return n
    except Exception:
        pass
    # Safe default: a size-2 "parallel" axis is ~free on 1-TC chips (the
    # duplicate-block / mask overhead is pl.when-gated below), but n=1 on a
    # 2-TC chip would leave half the HBM bandwidth on the table.
    return 2


def _xtanh_kernel(y_ref, yp_ref, out_ref, acc_ref, *,
                  block_rows, rows, total_blocks, blocks_per_core, needs_mask):
    i = pl.program_id(0)   # parallel (core) axis
    j = pl.program_id(1)   # arbitrary (reduction) axis

    @pl.when(j == 0)
    def _():
        acc_ref[...] = jnp.zeros_like(acc_ref)

    ey = y_ref[...].astype(jnp.float32) - yp_ref[...].astype(jnp.float32)

    def accumulate(ey_block):
        contrib = ey_block * jnp.tanh(ey_block)
        # (block_rows,128) -> (block_rows//8, 8, 128): each (8,128) group is
        # exactly one f32 vreg, so this leading-axis reduce is pure VALU vreg
        # adds (no XLU) into a constant-size, single-vreg accumulator.
        acc_ref[...] += contrib.reshape(
            block_rows // _SUBLANES, _SUBLANES, _LANES).sum(axis=0)

    if needs_mask:
        # int32 index math: overflows only beyond ~2^31 rows (~2.7e11
        # elements), not a practical concern.
        logical_block = i * blocks_per_core + j
        block_start = logical_block * block_rows
        is_full = jnp.logical_and(logical_block < total_blocks,
                                  block_start + block_rows <= rows)

        @pl.when(is_full)
        def _():
            # Interior blocks: no iota/compare/where in the hot path.
            accumulate(ey)

        @pl.when(jnp.logical_not(is_full))
        def _():
            # Mask BEFORE tanh: out-of-range rows hold garbage (stale VMEM for
            # a partial trailing block, or a clamped duplicate block) and must
            # contribute exactly 0.
            row_iota = lax.broadcasted_iota(jnp.int32, (block_rows, _LANES), 0)
            valid = (block_start + row_iota) < rows
            accumulate(jnp.where(valid, ey, 0.0))
    else:
        accumulate(ey)

    @pl.when(j == pl.num_programs(1) - 1)
    def _():
        # Single cross-lane (XLU) reduce of one vreg per core, once.
        out_ref[0, 0] = jnp.sum(acc_ref[...])


def xtanh_loss(y_t: jax.Array, y_prime_t: jax.Array, *,
               max_block_rows: int = _MAX_BLOCK_ROWS,
               n_parallel: int | None = None) -> jax.Array:
    """Pallas implementation of XTanhLoss.forward (full mean reduction)."""
    assert y_t.shape == y_prime_t.shape, "shapes must match (no broadcasting)"
    out_dtype = jnp.result_type(y_t.dtype, y_prime_t.dtype)
    n_elems = y_t.size
    if n_elems == 0:
        return jnp.array(jnp.nan, dtype=out_dtype)   # matches torch.mean([])

    # Flatten in the native dtype.  For 8*128-aligned element counts this is a
    # free contiguous reshape (no extra HBM pass).
    y_flat = y_t.reshape(-1)
    yp_flat = y_prime_t.reshape(-1)
    tile = _SUBLANES * _LANES
    padded = pl.cdiv(n_elems, tile) * tile
    if padded != n_elems:
        # TODO(synk): the ragged-tail pad copies both inputs once in HBM; a
        # manual-DMA (pl.ANY) path or a plain-JAX tail sum would avoid it if
        # ragged shapes ever become the common case.
        pad = padded - n_elems
        y_flat = jnp.pad(y_flat, (0, pad))
        yp_flat = jnp.pad(yp_flat, (0, pad))

    rows = padded // _LANES
    y2d = y_flat.reshape(rows, _LANES)
    yp2d = yp_flat.reshape(rows, _LANES)

    block_rows = min(max_block_rows, rows)            # rows is a multiple of 8
    total_blocks = pl.cdiv(rows, block_rows)
    if n_parallel is None:
        n_parallel = _num_tensorcores()
    n_parallel = min(n_parallel, total_blocks)
    blocks_per_core = pl.cdiv(total_blocks, n_parallel)
    # Masking is only needed if the last row-block is partial or a core
    # re-reads a clamped duplicate block; explicit zero padding contributes 0.
    needs_mask = (total_blocks * block_rows != rows) or (
        n_parallel * blocks_per_core != total_blocks)

    def in_index_map(i, j):
        # Clamp so a core with fewer real blocks re-reads a valid block; its
        # contribution is zeroed in-kernel via the unclamped logical index.
        b = jnp.minimum(i * blocks_per_core + j, total_blocks - 1)
        return (b, 0)

    kernel = functools.partial(
        _xtanh_kernel, block_rows=block_rows, rows=rows,
        total_blocks=total_blocks, blocks_per_core=blocks_per_core,
        needs_mask=needs_mask)

    partials = pl.pallas_call(
        kernel,
        out_shape=jax.ShapeDtypeStruct((n_parallel, 1), jnp.float32),
        grid_spec=pltpu.PrefetchScalarGridSpec(
            num_scalar_prefetch=0,
            grid=(n_parallel, blocks_per_core),
            in_specs=[
                pl.BlockSpec((block_rows, _LANES), in_index_map),
                pl.BlockSpec((block_rows, _LANES), in_index_map),
            ],
            out_specs=pl.BlockSpec((1, 1), lambda i, j: (i, 0),
                                   memory_space=pltpu.SMEM),
            # Single vreg-sized accumulator (constant size, independent of
            # block_rows) instead of a full-block RMW buffer.
            scratch_shapes=[pltpu.VMEM((_SUBLANES, _LANES), jnp.float32)],
        ),
        compiler_params=pltpu.CompilerParams(
            dimension_semantics=("parallel", "arbitrary"),
            vmem_limit_bytes=_VMEM_LIMIT_BYTES),
    )(y2d, yp2d)

    mean = jnp.sum(partials) / jnp.float32(n_elems)
    return mean.astype(out_dtype)


if __name__ == "__main__":
    key = jax.random.PRNGKey(0)
    k1, k2 = jax.random.split(key)

    def ref_loss(a, b):
        ey = a - b
        return jnp.mean(ey * jnp.tanh(ey))

    # Small shapes consistent with a generic regression target (NCHW-like).
    shape = (2, 4, 16, 16)
    y_t = jax.random.normal(k1, shape, dtype=jnp.float32)
    y_prime_t = jax.random.normal(k2, shape, dtype=jnp.float32)
    loss = xtanh_loss(y_t, y_prime_t)
    jax.block_until_ready(loss)
    assert jnp.allclose(loss, ref_loss(y_t, y_prime_t), atol=1e-5, rtol=1e-5), (
        loss, ref_loss(y_t, y_prime_t))

    # Ragged element count: exercises the zero-pad path.
    z1 = jax.random.normal(k1, (3, 5, 7), dtype=jnp.float32)
    z2 = jax.random.normal(k2, (3, 5, 7), dtype=jnp.float32)
    loss2 = xtanh_loss(z1, z2)
    jax.block_until_ready(loss2)
    assert jnp.allclose(loss2, ref_loss(z1, z2), atol=1e-5, rtol=1e-5), (
        loss2, ref_loss(z1, z2))

    # Multi-block, forced 2-way parallel split, partial trailing block:
    # exercises the pl.when-gated mask path (small blocks only for testing).
    w1 = jax.random.normal(k1, (5, 555), dtype=jnp.float32)
    w2 = jax.random.normal(k2, (5, 555), dtype=jnp.float32)
    loss3 = xtanh_loss(w1, w2, max_block_rows=16, n_parallel=2)
    jax.block_until_ready(loss3)
    assert jnp.allclose(loss3, ref_loss(w1, w2), atol=1e-5, rtol=1e-5), (
        loss3, ref_loss(w1, w2))

    # Odd block count with 2-way split: exercises the clamped-duplicate path.
    loss4 = xtanh_loss(w1, w2, max_block_rows=8, n_parallel=2)
    jax.block_until_ready(loss4)
    assert jnp.allclose(loss4, ref_loss(w1, w2), atol=1e-5, rtol=1e-5), (
        loss4, ref_loss(w1, w2))

    print("KERNEL_OK")
</pallas_src>

<mosaic_0001>
module attributes {stable_mosaic.version = 11 : i64} {
  func.func @_xtanh_kernel(%arg0: i32, %arg1: i32, %arg2: memref<16x128xf32, #tpu.memory_space<vmem>>, %arg3: memref<16x128xf32, #tpu.memory_space<vmem>>, %arg4: memref<1x1xf32, #tpu.memory_space<smem>>, %arg5: memref<8x128xf32, #tpu.memory_space<vmem>>) attributes {dimension_semantics = [#tpu.dimension_semantics<parallel>, #tpu.dimension_semantics<arbitrary>], iteration_bounds = array<i64: 1, 1>, scalar_prefetch = 0 : i64, scratch_operands = 1 : i64, tpu.core_type = #tpu.core_type<tc>, window_params = [{transform_indices = @transform_0, window_bounds = array<i64: 16, 128>}, {transform_indices = @transform_1, window_bounds = array<i64: 16, 128>}, {transform_indices = @transform_2, window_bounds = array<i64: 1, 1>}]} {
    %c0_i32 = arith.constant 0 : i32
    %0 = arith.cmpi eq, %arg1, %c0_i32 : i32
    %1 = arith.extui %0 : i1 to i32
    %c0_i32_0 = arith.constant 0 : i32
    %2 = arith.cmpi ne, %1, %c0_i32_0 : i32
    scf.if %2 {
      %cst_10 = arith.constant 0.000000e+00 : f32
      %16 = vector.broadcast %cst_10 : f32 to vector<8x128xf32>
      %c0_11 = arith.constant 0 : index
      %c0_12 = arith.constant 0 : index
      %17 = vector.load %arg5[%c0_11, %c0_12] : memref<8x128xf32, #tpu.memory_space<vmem>>, vector<8x128xf32>
      tpu.vector_store %arg5[%c0_11, %c0_12], %16 {strides = array<i32>} : memref<8x128xf32, #tpu.memory_space<vmem>>, vector<8x128xf32>,
    } else {
    }
    %c0 = arith.constant 0 : index
    %c0_1 = arith.constant 0 : index
    %3 = vector.load %arg2[%c0, %c0_1] : memref<16x128xf32, #tpu.memory_space<vmem>>, vector<16x128xf32>
    %c0_2 = arith.constant 0 : index
    %c0_3 = arith.constant 0 : index
    %4 = vector.load %arg3[%c0_2, %c0_3] : memref<16x128xf32, #tpu.memory_space<vmem>>, vector<16x128xf32>
    %5 = arith.subf %3, %4 : vector<16x128xf32>
    %6 = math.tanh %5 : vector<16x128xf32>
    %7 = arith.mulf %5, %6 : vector<16x128xf32>
    %c0_4 = arith.constant 0 : index
    %c0_5 = arith.constant 0 : index
    %8 = vector.load %arg5[%c0_4, %c0_5] : memref<8x128xf32, #tpu.memory_space<vmem>>, vector<8x128xf32>
    %9 = vector.shape_cast %7 : vector<16x128xf32> to vector<2x8x128xf32>
    %cst = arith.constant dense<0.000000e+00> : vector<8x128xf32>
    %10 = vector.multi_reduction <add>, %9, %cst [0] : vector<2x8x128xf32> to vector<8x128xf32>
    %11 = arith.addf %8, %10 : vector<8x128xf32>
    %c0_6 = arith.constant 0 : index
    %c0_7 = arith.constant 0 : index
    %12 = vector.load %arg5[%c0_6, %c0_7] : memref<8x128xf32, #tpu.memory_space<vmem>>, vector<8x128xf32>
    tpu.vector_store %arg5[%c0_6, %c0_7], %11 {strides = array<i32>} : memref<8x128xf32, #tpu.memory_space<vmem>>, vector<8x128xf32>,
    %c0_i32_8 = arith.constant 0 : i32
    %13 = arith.cmpi eq, %arg1, %c0_i32_8 : i32
    %14 = arith.extui %13 : i1 to i32
    %c0_i32_9 = arith.constant 0 : i32
    %15 = arith.cmpi ne, %14, %c0_i32_9 : i32
    scf.if %15 {
      %c0_10 = arith.constant 0 : index
      %c0_11 = arith.constant 0 : index
      %16 = vector.load %arg5[%c0_10, %c0_11] : memref<8x128xf32, #tpu.memory_space<vmem>>, vector<8x128xf32>
      %17 = vector.shape_cast %16 : vector<8x128xf32> to vector<1x8x128xf32>
      %cst_12 = arith.constant dense<0.000000e+00> : vector<1xf32>
      %18 = vector.multi_reduction <add>, %17, %cst_12 [1, 2] : vector<1x8x128xf32> to vector<1xf32>
      %19 = vector.shape_cast %18 : vector<1xf32> to vector<1x1x1xf32>
      %20 = vector.extract %19[0, 0, 0] : f32 from vector<1x1x1xf32>
      %c0_13 = arith.constant 0 : index
      %c0_14 = arith.constant 0 : index
      %21 = memref.load %arg4[%c0_13, %c0_14] : memref<1x1xf32, #tpu.memory_space<smem>>
      memref.store %20, %arg4[%c0_13, %c0_14] : memref<1x1xf32, #tpu.memory_space<smem>>
    } else {
    }
    return
  }
  func.func @transform_0(%arg0: i32, %arg1: i32) -> (i32, i32) {
    %c1_i32 = arith.constant 1 : i32
    %0 = arith.muli %arg0, %c1_i32 : i32
    %1 = arith.addi %0, %arg1 : i32
    %c0_i32 = arith.constant 0 : i32
    %2 = arith.minsi %1, %c0_i32 : i32
    %c0_i32_0 = arith.constant 0 : i32
    %c0_i32_1 = arith.constant 0 : i32
    return %2, %c0_i32_0 : i32, i32
  }
  func.func @transform_1(%arg0: i32, %arg1: i32) -> (i32, i32) {
    %c1_i32 = arith.constant 1 : i32
    %0 = arith.muli %arg0, %c1_i32 : i32
    %1 = arith.addi %0, %arg1 : i32
    %c0_i32 = arith.constant 0 : i32
    %2 = arith.minsi %1, %c0_i32 : i32
    %c0_i32_0 = arith.constant 0 : i32
    %c0_i32_1 = arith.constant 0 : i32
    return %2, %c0_i32_0 : i32, i32
  }
  func.func @transform_2(%arg0: i32, %arg1: i32) -> (i32, i32) {
    %c0_i32 = arith.constant 0 : i32
    %c0_i32_0 = arith.constant 0 : i32
    return %arg0, %c0_i32 : i32, i32
  }
}

</mosaic_0001>

<bundles_post_ra>
// kernel: tpu_custom_call.1
= control target key start
LH: loop header
LB: loop body
LE: loop exit
PB: predicated region body
PF: predicated region fallthrough
CT: control target
= control target key end

     0   :  { %7 = vsyncpa [#allocation4], 0  ;;  %s240_s0 = inlined_call_operand.hbm [shape: f32[16,128], index: 0, kind: input, shape index: {}]   ;;  %s241_s1 = inlined_call_operand.hbm [shape: f32[16,128], index: 1, kind: input, shape index: {}]   ;;  %s242_s2 = inlined_call_operand.hbm [shape: f32[1,1], index: 2, kind: output, shape index: {}]  }
   0x1   :  { %8 = vsyncpa [#allocation7], 0 }
   0x2   :  { %9 = vsyncpa [#allocation5], 0  ;;  %s184_s9 = smov [#allocation3]   ;;  %s124_s13 = scalar_lea.hbm %s240_s0, 256 }
   0x3   :  { %s21_s10 = sshll.u32 %s184_s9, 4  ;;  %p125_p0 = scmp.ne.s32.totalorder %s240_s0, %s124_s13  ;;  %s22_s10 = int_to_ptr.vmem [resolvable:$true] %s21_s10 }
   0x4   :  { %p128_p1 = scmp.lt.u32.totalorder %s124_s13, %s240_s0 }
   0x6   :  { %p130_p2 = pnand %p128_p1, %p125_p0 }
   0x8   :  { %133 = shalt.err (!%p130_p2)
}
   0x9   :  { %s134_s18 = scalar_lea.vmem %s22_s10, 256  ;;  %p139_p4 = scmp.lt.s32.totalorder %s22_s10, %s22_s10 }
   0xa   :  { %p135_p3 = scmp.ne.s32.totalorder %s22_s10, %s134_s18  ;;  %p140_p5 = scmp.lt.s32.totalorder %s134_s18, %s134_s18 }
   0xc   :  { %p141_p6 = por %p140_p5, %p139_p4 }
   0xe   :  { %p142_p7 = pnand %p141_p6, %p135_p3 }
  0x10   :  { %145 = shalt.err (!%p142_p7)
}
  0x11   :  { %s185_s19 = smov 128   ;;  %s186_s20 = smov 8  }
  0x12   :  { %27 = dma.hbm_to_vmem [thread:$0]  %s240_s0, 256, %s22_s10, [#allocation4], %s185_s19, %s185_s19, %s186_s20  }
  0x13   :  { %s187_s23 = smov [#allocation6]   ;;  %s146_s27 = scalar_lea.hbm %s241_s1, 256 }
  0x14   :  { %s39_s24 = sshll.u32 %s187_s23, 4  ;;  %p147_p8 = scmp.ne.s32.totalorder %s241_s1, %s146_s27  ;;  %s40_s24 = int_to_ptr.vmem [resolvable:$true] %s39_s24 }
  0x15   :  { %p150_p9 = scmp.lt.u32.totalorder %s146_s27, %s241_s1 }
  0x17   :  { %p152_p10 = pnand %p150_p9, %p147_p8 }
  0x19   :  { %155 = shalt.err (!%p152_p10)
}
  0x1a   :  { %s156_s4 = scalar_lea.vmem %s40_s24, 256  ;;  %p161_p12 = scmp.lt.s32.totalorder %s40_s24, %s40_s24 }
  0x1b   :  { %p157_p11 = scmp.ne.s32.totalorder %s40_s24, %s156_s4  ;;  %p162_p13 = scmp.lt.s32.totalorder %s156_s4, %s156_s4 }
  0x1d   :  { %p163_p0 = por %p162_p13, %p161_p12 }
  0x1f   :  { %p164_p1 = pnand %p163_p0, %p157_p11 }
  0x21   :  { %167 = shalt.err (!%p164_p1)
}
  0x22   :  { %45 = dma.hbm_to_vmem [thread:$0]  %s241_s1, 256, %s40_s24, [#allocation7], %s185_s19, %s185_s19, %s186_s20  }
  0x23   :  { %178 = dma.done.wait [#allocation4], 256  }
  0x24   :  { %179 = vsyncadd [#allocation4], 4294967040 }
  0x25   :  { %180 = dma.done.wait [#allocation7], 256  }
  0x26   :  { %181 = vsyncadd [#allocation7], 4294967040  ;;  %v65_v0 = vld [vmem:[#allocation3] sm:$0xff]  ;;  %v66_v1 = vld [vmem:[#allocation3 + $0x8] sm:$0xff]  ;;  %s168_s8 = scalar_lea.hbm %s242_s2, 16 }
  0x27   :  { %v67_v2 = vld [vmem:[#allocation6] sm:$0xff]  ;;  %v68_v3 = vld [vmem:[#allocation6 + $0x8] sm:$0xff]  ;;  %p169_p2 = scmp.ne.s32.totalorder %s242_s2, %s168_s8  ;;  %p172_p3 = scmp.lt.u32.totalorder %s168_s8, %s242_s2 }
  0x28   :  { %v69_v4 = vsub.f32 %v65_v0, %v67_v2  ;;  %v70_v5 = vsub.f32 %v66_v1, %v68_v3 }
  0x29   :  { %p174_p4 = pnand %p172_p3, %p169_p2 }
  0x2a   :  { %120 = vtanh.f32 %v69_v4 }
  0x2b   :  { %122 = vtanh.f32 %v70_v5 }
  0x34   :  { %v121_v6 = vpop.eup %120 }
  0x35   :  { %v123_v7 = vpop.eup %122  ;;  %v73_v8 = vmul.f32 %v121_v6, %v69_v4 }
  0x36   :  { %v74_v9 = vmul.f32 %v123_v7, %v70_v5 }
  0x38   :  { %v76_v10 = vadd.f32 %v74_v9, %v73_v8 }
  0x3a   :  { %83 = vadd.xlane.f32.xlu0 %v76_v10 }
  0xc7   :  { %v84_v11 = vpop.xlane.xlu0 %83 }
  0xc8   :  { %v85_v12 = vrot.slane %v84_v11, 4 }
  0xca   :  { %v86_v13 = vadd.f32 %v85_v12, %v84_v11 }
  0xcc   :  { %v87_v14 = vrot.slane %v86_v13, 2 }
  0xce   :  { %v88_v15 = vadd.f32 %v87_v14, %v86_v13 }
  0xd0   :  { %v89_v16 = vrot.slane %v88_v15, 1 }
  0xd2   :  { %v90_v17 = vadd.f32 %v89_v16, %v88_v15 }
  0xd4   :  { %113 = vpush %v90_v17 }
 0x105   :  { %s114_s1 = spop %113 }
 0x106   :  { %93 = sst [smem:[#allocation8]] %s114_s1 }
 0x107   :  { %177 = shalt.err (!%p174_p4)
}
 0x108   :  { %s188_s13 = smov [#allocation8]  }
 0x109   :  { %101 = dma.smem_to_hbm %s188_s13, 16, %s242_s2, [#allocation5]  }
 0x10a   :  { %182 = dma.done.wait [#allocation5], 16  }
 0x10b   :  { %183 = vsyncadd [#allocation5], 4294967280 }
 0x10c   :  { %105 = sfence }
 0x10d   :  { %106 = vsyncpa [#allocation4], 1 }
 0x10e   :  { %107 = vsyncpa [#allocation7], 1 }
 0x10f   :  { %108 = vsyncpa [#allocation5], 1 }

</bundles_post_ra>
